<compile_context>
chip_gen: v7x
topology: tpu7x:2x2x1
jax: 0.10.0
libtpu: 0.0.40
codegen_flags: <defaults>
</compile_context>

<pallas_src>
from functools import partial

import jax
import jax.numpy as jnp
from jax import lax
from jax.experimental import pallas as pl
from jax.experimental.pallas import tpu as pltpu

EPS = 1e-5


# --------------------------------------------------------------------------
# Kernel 1: single-pass BN statistics + fold into conv weight/bias.
#   x2d      (C, NHW_pad)   channels on sublanes, pixels on lanes (zero padded)
#   gamma    (C, 1), beta (C, 1)       selected domain's affine params
#   w3       (9, C, OC_pad)  w3[k, c, oc] = w[oc, c, kh, kw], k = kh*3 + kw
#   brow     (1, OC_pad)
# Outputs:
#   wf3      (9, C, OC_pad)  folded weight  w * scale_c
#   bf       (1, OC_pad)     folded bias    b + sum_c shift_c * sum_k w
# --------------------------------------------------------------------------
def bn_fold_kernel(x_ref, gamma_ref, beta_ref, w3_ref, b_ref,
                   wf_ref, bf_ref, s_acc, sq_acc, *, n_valid):
    j = pl.program_id(0)

    @pl.when(j == 0)
    def _():
        s_acc[...] = jnp.zeros_like(s_acc)
        sq_acc[...] = jnp.zeros_like(sq_acc)

    # Single pass: accumulate sum and sum-of-squares (zero padding adds 0).
    x = x_ref[...]                                              # (C, TILE_L) f32
    s_acc[...] += jnp.sum(x, axis=1, keepdims=True)             # (C, 1)
    sq_acc[...] += jnp.sum(x * x, axis=1, keepdims=True)        # (C, 1)

    @pl.when(j == pl.num_programs(0) - 1)
    def _():
        inv_n = jnp.float32(1.0 / n_valid)
        mean = s_acc[...] * inv_n                               # (C, 1)
        var = jnp.maximum(sq_acc[...] * inv_n - mean * mean, 0.0)
        scale = gamma_ref[...] * lax.rsqrt(var + EPS)           # (C, 1)
        shift = beta_ref[...] - mean * scale                    # (C, 1)

        # Fold BN scale into the conv weight (per-channel row scaling).
        n_taps = w3_ref.shape[0]                                # static (= 9)
        wsum = w3_ref[0]                                        # (C, OC_pad)
        wf_ref[0] = w3_ref[0] * scale
        for k in range(1, n_taps):
            wk = w3_ref[k]
            wf_ref[k] = wk * scale
            wsum = wsum + wk
        # Fold BN shift into the conv bias.
        bf_ref[...] = b_ref[...] + jnp.sum(shift * wsum, axis=0, keepdims=True)


# --------------------------------------------------------------------------
# Kernel 2: tiled conv-as-matmul on pre-folded weights.
#   patch (TILE_R, C*9)  @  wf (C*9, OC_pad)  + bf (1, OC_pad)
# Lane-dense output (OC_pad multiple of 128); f32 accumulation on the MXU.
# --------------------------------------------------------------------------
def conv_fold_kernel(patch_ref, wf_ref, bf_ref, out_ref):
    out_ref[...] = (
        jnp.dot(patch_ref[...], wf_ref[...], preferred_element_type=jnp.float32)
        + bf_ref[...]
    )


@partial(jax.jit, static_argnames=("tile_r", "tile_l", "matmul_dtype"))
def net_forward(x, domain, params, *, tile_r=256, tile_l=512,
                matmul_dtype=jnp.float32):
    """x: (N, C, H, W) float32 (NCHW as in PyTorch). domain: int32 vector."""
    N, C, H, W = x.shape
    gammas, betas, w, b = params["gammas"], params["betas"], params["w"], params["b"]
    OC = w.shape[0]
    KH = KW = 3
    OH, OW = H - KH + 1, W - KW + 1
    R = N * OH * OW
    K = C * KH * KW
    NHW = N * H * W
    OC_pad = ((OC + 127) // 128) * 128          # lane-dense output stores

    # ---- glue (fused under jit): domain selection, layouts, padding ----
    d = domain[0].astype(jnp.int32)                           # domain[0].int()
    gamma = jnp.take(gammas, d, axis=0).reshape(C, 1)
    beta = jnp.take(betas, d, axis=0).reshape(C, 1)

    # Stats slab: (C, NHW), zero-padded on lanes (zeros don't affect sum/sumsq).
    x2d = jnp.transpose(x, (1, 0, 2, 3)).reshape(C, NHW)
    nhw_pad = ((NHW + tile_l - 1) // tile_l) * tile_l
    x2d = jnp.pad(x2d, ((0, 0), (0, nhw_pad - NHW)))

    # Conv weight as (9, C, OC_pad): w3[k, c, oc] = w[oc, c, kh, kw].
    w3 = jnp.transpose(w, (2, 3, 1, 0)).reshape(KH * KW, C, OC)
    w3 = jnp.pad(w3, ((0, 0), (0, 0), (0, OC_pad - OC)))
    brow = jnp.pad(b.reshape(1, OC), ((0, 0), (0, OC_pad - OC)))

    # ---- Kernel 1: BN stats + fold (tiny; reduction over the lane axis) ----
    wf3, bf = pl.pallas_call(
        partial(bn_fold_kernel, n_valid=float(NHW)),
        out_shape=(
            jax.ShapeDtypeStruct((KH * KW, C, OC_pad), jnp.float32),
            jax.ShapeDtypeStruct((1, OC_pad), jnp.float32),
        ),
        grid=(nhw_pad // tile_l,),
        in_specs=[
            pl.BlockSpec((C, tile_l), lambda j: (0, j)),
            pl.BlockSpec((C, 1), lambda j: (0, 0)),
            pl.BlockSpec((C, 1), lambda j: (0, 0)),
            pl.BlockSpec((KH * KW, C, OC_pad), lambda j: (0, 0, 0)),
            pl.BlockSpec((1, OC_pad), lambda j: (0, 0)),
        ],
        out_specs=[
            pl.BlockSpec((KH * KW, C, OC_pad), lambda j: (0, 0, 0)),
            pl.BlockSpec((1, OC_pad), lambda j: (0, 0)),
        ],
        scratch_shapes=[
            pltpu.VMEM((C, 1), jnp.float32),
            pltpu.VMEM((C, 1), jnp.float32),
        ],
        compiler_params=pltpu.CompilerParams(
            dimension_semantics=("arbitrary",),
        ),
    )(x2d, gamma, beta, w3, brow)

    wf = wf3.reshape(K, OC_pad).astype(matmul_dtype)          # (C*9, OC_pad)

    # im2col patches (R_pad, C*9), column j = (kh*KW + kw)*C + c.
    taps = [x[:, :, kh:kh + OH, kw:kw + OW]
            for kh in range(KH) for kw in range(KW)]
    patch = jnp.stack(taps, axis=1)                            # (N, 9, C, OH, OW)
    patch = jnp.transpose(patch, (0, 3, 4, 1, 2)).reshape(R, K)
    r_pad = ((R + tile_r - 1) // tile_r) * tile_r
    patch = jnp.pad(patch, ((0, r_pad - R), (0, 0))).astype(matmul_dtype)

    # ---- Kernel 2: pipelined, megacore-parallel matmul over R tiles ----
    out2 = pl.pallas_call(
        conv_fold_kernel,
        out_shape=jax.ShapeDtypeStruct((r_pad, OC_pad), jnp.float32),
        grid=(r_pad // tile_r,),
        in_specs=[
            pl.BlockSpec((tile_r, K), lambda i: (i, 0)),
            pl.BlockSpec((K, OC_pad), lambda i: (0, 0)),
            pl.BlockSpec((1, OC_pad), lambda i: (0, 0)),
        ],
        out_specs=pl.BlockSpec((tile_r, OC_pad), lambda i: (i, 0)),
        compiler_params=pltpu.CompilerParams(
            dimension_semantics=("parallel",),
        ),
    )(patch, wf, bf)

    # strip padding, back to NCHW
    out = out2[:R, :OC].reshape(N, OH, OW, OC).transpose(0, 3, 1, 2)
    return out


def reference_forward(x, domain, params):
    """Pure-JAX reference (AdaBN training-mode BN + VALID conv3x3 + bias)."""
    d = int(domain[0])
    gamma = params["gammas"][d].reshape(1, -1, 1, 1)
    beta = params["betas"][d].reshape(1, -1, 1, 1)
    mean = x.mean(axis=(0, 2, 3), keepdims=True)
    var = ((x - mean) ** 2).mean(axis=(0, 2, 3), keepdims=True)
    xn = (x - mean) / jnp.sqrt(var + EPS) * gamma + beta
    out = lax.conv_general_dilated(
        xn, params["w"], window_strides=(1, 1), padding="VALID",
        dimension_numbers=("NCHW", "OIHW", "NCHW"))
    return out + params["b"].reshape(1, -1, 1, 1)


if __name__ == "__main__":
    # Small shapes consistent with the module: batch=2, in_size=4, out_size=8, 16x16
    N, C, OC, H, W = 2, 4, 8, 16, 16
    NUM_DOMAINS = 3

    key = jax.random.PRNGKey(0)
    kx, kg, kb, kw, kbi = jax.random.split(key, 5)

    x = jax.random.normal(kx, (N, C, H, W), dtype=jnp.float32)
    domain = jnp.array([1], dtype=jnp.int32)

    params = {
        # per-domain BN affine parameters (AdaptiveBatchNorm2d: one BN per domain)
        "gammas": 1.0 + 0.1 * jax.random.normal(kg, (NUM_DOMAINS, C), dtype=jnp.float32),
        "betas": 0.1 * jax.random.normal(kb, (NUM_DOMAINS, C), dtype=jnp.float32),
        # Conv2d(C, OC, 3) weight/bias, OIHW
        "w": 0.1 * jax.random.normal(kw, (OC, C, 3, 3), dtype=jnp.float32),
        "b": 0.1 * jax.random.normal(kbi, (OC,), dtype=jnp.float32),
    }

    ref = reference_forward(x, domain, params)

    # f32 MXU path (strict tolerance).
    out = jax.block_until_ready(net_forward(x, domain, params))
    assert out.shape == (N, OC, H - 2, W - 2), out.shape
    assert jnp.allclose(out, ref, rtol=1e-3, atol=1e-3), float(jnp.abs(out - ref).max())

    # bf16 MXU path (v6e/v7x fast path; halves patch DMA bytes).  bf16 inputs,
    # f32 accumulation -> looser tolerance.
    out_bf16 = jax.block_until_ready(
        net_forward(x, domain, params, matmul_dtype=jnp.bfloat16))
    assert jnp.allclose(out_bf16, ref, rtol=2e-2, atol=2e-2), \
        float(jnp.abs(out_bf16 - ref).max())

    print("KERNEL_OK")
</pallas_src>

<mosaic_0001>
module attributes {stable_mosaic.version = 11 : i64} {
  func.func @bn_fold_kernel(%arg0: i32, %arg1: memref<4x512xf32, #tpu.memory_space<vmem>>, %arg2: memref<4x1xf32, #tpu.memory_space<vmem>>, %arg3: memref<4x1xf32, #tpu.memory_space<vmem>>, %arg4: memref<9x4x128xf32, #tpu.memory_space<vmem>>, %arg5: memref<1x128xf32, #tpu.memory_space<vmem>>, %arg6: memref<9x4x128xf32, #tpu.memory_space<vmem>>, %arg7: memref<1x128xf32, #tpu.memory_space<vmem>>, %arg8: memref<4x1xf32, #tpu.memory_space<vmem>>, %arg9: memref<4x1xf32, #tpu.memory_space<vmem>>) attributes {dimension_semantics = [#tpu.dimension_semantics<arbitrary>], iteration_bounds = array<i64: 1>, scalar_prefetch = 0 : i64, scratch_operands = 2 : i64, tpu.core_type = #tpu.core_type<tc>, window_params = [{transform_indices = @transform_0, window_bounds = array<i64: 4, 512>}, {pipeline_mode = #tpu.pipeline_mode<synchronous>, transform_indices = @transform_1, window_bounds = array<i64: 4, 1>}, {pipeline_mode = #tpu.pipeline_mode<synchronous>, transform_indices = @transform_2, window_bounds = array<i64: 4, 1>}, {pipeline_mode = #tpu.pipeline_mode<synchronous>, transform_indices = @transform_3, window_bounds = array<i64: 9, 4, 128>}, {pipeline_mode = #tpu.pipeline_mode<synchronous>, transform_indices = @transform_4, window_bounds = array<i64: 1, 128>}, {pipeline_mode = #tpu.pipeline_mode<synchronous>, transform_indices = @transform_5, window_bounds = array<i64: 9, 4, 128>}, {pipeline_mode = #tpu.pipeline_mode<synchronous>, transform_indices = @transform_6, window_bounds = array<i64: 1, 128>}]} {
    %c0_i32 = arith.constant 0 : i32
    %0 = arith.cmpi eq, %arg0, %c0_i32 : i32
    %1 = arith.extui %0 : i1 to i32
    %c0_i32_0 = arith.constant 0 : i32
    %2 = arith.cmpi ne, %1, %c0_i32_0 : i32
    scf.if %2 {
      %cst_13 = arith.constant 0.000000e+00 : f32
      %18 = vector.broadcast %cst_13 : f32 to vector<4x1xf32>
      %c0_14 = arith.constant 0 : index
      %c0_15 = arith.constant 0 : index
      %19 = vector.load %arg8[%c0_14, %c0_15] : memref<4x1xf32, #tpu.memory_space<vmem>>, vector<4x1xf32>
      tpu.vector_store %arg8[%c0_14, %c0_15], %18 {strides = array<i32>} : memref<4x1xf32, #tpu.memory_space<vmem>>, vector<4x1xf32>,
      %cst_16 = arith.constant 0.000000e+00 : f32
      %20 = vector.broadcast %cst_16 : f32 to vector<4x1xf32>
      %c0_17 = arith.constant 0 : index
      %c0_18 = arith.constant 0 : index
      %21 = vector.load %arg9[%c0_17, %c0_18] : memref<4x1xf32, #tpu.memory_space<vmem>>, vector<4x1xf32>
      tpu.vector_store %arg9[%c0_17, %c0_18], %20 {strides = array<i32>} : memref<4x1xf32, #tpu.memory_space<vmem>>, vector<4x1xf32>,
    } else {
    }
    %c0 = arith.constant 0 : index
    %c0_1 = arith.constant 0 : index
    %3 = vector.load %arg1[%c0, %c0_1] : memref<4x512xf32, #tpu.memory_space<vmem>>, vector<4x512xf32>
    %c0_2 = arith.constant 0 : index
    %c0_3 = arith.constant 0 : index
    %4 = vector.load %arg8[%c0_2, %c0_3] : memref<4x1xf32, #tpu.memory_space<vmem>>, vector<4x1xf32>
    %cst = arith.constant dense<0.000000e+00> : vector<4xf32>
    %5 = vector.multi_reduction <add>, %3, %cst [1] : vector<4x512xf32> to vector<4xf32>
    %6 = vector.shape_cast %5 : vector<4xf32> to vector<4x1xf32>
    %7 = arith.addf %4, %6 : vector<4x1xf32>
    %c0_4 = arith.constant 0 : index
    %c0_5 = arith.constant 0 : index
    %8 = vector.load %arg8[%c0_4, %c0_5] : memref<4x1xf32, #tpu.memory_space<vmem>>, vector<4x1xf32>
    tpu.vector_store %arg8[%c0_4, %c0_5], %7 {strides = array<i32>} : memref<4x1xf32, #tpu.memory_space<vmem>>, vector<4x1xf32>,
    %c0_6 = arith.constant 0 : index
    %c0_7 = arith.constant 0 : index
    %9 = vector.load %arg9[%c0_6, %c0_7] : memref<4x1xf32, #tpu.memory_space<vmem>>, vector<4x1xf32>
    %10 = arith.mulf %3, %3 : vector<4x512xf32>
    %cst_8 = arith.constant dense<0.000000e+00> : vector<4xf32>
    %11 = vector.multi_reduction <add>, %10, %cst_8 [1] : vector<4x512xf32> to vector<4xf32>
    %12 = vector.shape_cast %11 : vector<4xf32> to vector<4x1xf32>
    %13 = arith.addf %9, %12 : vector<4x1xf32>
    %c0_9 = arith.constant 0 : index
    %c0_10 = arith.constant 0 : index
    %14 = vector.load %arg9[%c0_9, %c0_10] : memref<4x1xf32, #tpu.memory_space<vmem>>, vector<4x1xf32>
    tpu.vector_store %arg9[%c0_9, %c0_10], %13 {strides = array<i32>} : memref<4x1xf32, #tpu.memory_space<vmem>>, vector<4x1xf32>,
    %c0_i32_11 = arith.constant 0 : i32
    %15 = arith.cmpi eq, %arg0, %c0_i32_11 : i32
    %16 = arith.extui %15 : i1 to i32
    %c0_i32_12 = arith.constant 0 : i32
    %17 = arith.cmpi ne, %16, %c0_i32_12 : i32
    scf.if %17 {
      %c0_13 = arith.constant 0 : index
      %c0_14 = arith.constant 0 : index
      %18 = vector.load %arg8[%c0_13, %c0_14] : memref<4x1xf32, #tpu.memory_space<vmem>>, vector<4x1xf32>
      %cst_15 = arith.constant 0.001953125 : f32
      %19 = vector.broadcast %cst_15 : f32 to vector<4x1xf32>
      %20 = arith.mulf %18, %19 : vector<4x1xf32>
      %c0_16 = arith.constant 0 : index
      %c0_17 = arith.constant 0 : index
      %21 = vector.load %arg9[%c0_16, %c0_17] : memref<4x1xf32, #tpu.memory_space<vmem>>, vector<4x1xf32>
      %cst_18 = arith.constant 0.001953125 : f32
      %22 = vector.broadcast %cst_18 : f32 to vector<4x1xf32>
      %23 = arith.mulf %21, %22 : vector<4x1xf32>
      %24 = arith.mulf %20, %20 : vector<4x1xf32>
      %25 = arith.subf %23, %24 : vector<4x1xf32>
      %cst_19 = arith.constant 0.000000e+00 : f32
      %26 = vector.broadcast %cst_19 : f32 to vector<4x1xf32>
      %27 = arith.maximumf %25, %26 : vector<4x1xf32>
      %c0_20 = arith.constant 0 : index
      %c0_21 = arith.constant 0 : index
      %28 = vector.load %arg2[%c0_20, %c0_21] : memref<4x1xf32, #tpu.memory_space<vmem>>, vector<4x1xf32>
      %cst_22 = arith.constant 9.99999974E-6 : f32
      %29 = vector.broadcast %cst_22 : f32 to vector<4x1xf32>
      %30 = arith.addf %27, %29 : vector<4x1xf32>
      %31 = math.rsqrt %30 : vector<4x1xf32>
      %32 = arith.mulf %28, %31 : vector<4x1xf32>
      %c0_23 = arith.constant 0 : index
      %c0_24 = arith.constant 0 : index
      %33 = vector.load %arg3[%c0_23, %c0_24] : memref<4x1xf32, #tpu.memory_space<vmem>>, vector<4x1xf32>
      %34 = arith.mulf %20, %32 : vector<4x1xf32>
      %35 = arith.subf %33, %34 : vector<4x1xf32>
      %c0_25 = arith.constant 0 : index
      %c0_26 = arith.constant 0 : index
      %c0_27 = arith.constant 0 : index
      %36 = vector.load %arg4[%c0_25, %c0_26, %c0_27] : memref<9x4x128xf32, #tpu.memory_space<vmem>>, vector<1x4x128xf32>
      %37 = vector.shape_cast %36 : vector<1x4x128xf32> to vector<4x128xf32>
      %c0_28 = arith.constant 0 : index
      %c0_29 = arith.constant 0 : index
      %c0_30 = arith.constant 0 : index
      %38 = vector.load %arg4[%c0_28, %c0_29, %c0_30] : memref<9x4x128xf32, #tpu.memory_space<vmem>>, vector<1x4x128xf32>
      %39 = vector.shape_cast %38 : vector<1x4x128xf32> to vector<4x128xf32>
      %40 = vector.broadcast %32 : vector<4x1xf32> to vector<4x128xf32>
      %41 = arith.mulf %39, %40 : vector<4x128xf32>
      %c0_31 = arith.constant 0 : index
      %c0_32 = arith.constant 0 : index
      %c0_33 = arith.constant 0 : index
      %42 = vector.load %arg6[%c0_31, %c0_32, %c0_33] : memref<9x4x128xf32, #tpu.memory_space<vmem>>, vector<1x4x128xf32>
      %43 = vector.shape_cast %42 : vector<1x4x128xf32> to vector<4x128xf32>
      %44 = vector.shape_cast %41 : vector<4x128xf32> to vector<1x4x128xf32>
      tpu.vector_store %arg6[%c0_31, %c0_32, %c0_33], %44 {strides = array<i32>} : memref<9x4x128xf32, #tpu.memory_space<vmem>>, vector<1x4x128xf32>,
      %c1 = arith.constant 1 : index
      %c0_34 = arith.constant 0 : index
      %c0_35 = arith.constant 0 : index
      %45 = vector.load %arg4[%c1, %c0_34, %c0_35] : memref<9x4x128xf32, #tpu.memory_space<vmem>>, vector<1x4x128xf32>
      %46 = vector.shape_cast %45 : vector<1x4x128xf32> to vector<4x128xf32>
      %47 = vector.broadcast %32 : vector<4x1xf32> to vector<4x128xf32>
      %48 = arith.mulf %46, %47 : vector<4x128xf32>
      %c1_36 = arith.constant 1 : index
      %c0_37 = arith.constant 0 : index
      %c0_38 = arith.constant 0 : index
      %49 = vector.load %arg6[%c1_36, %c0_37, %c0_38] : memref<9x4x128xf32, #tpu.memory_space<vmem>>, vector<1x4x128xf32>
      %50 = vector.shape_cast %49 : vector<1x4x128xf32> to vector<4x128xf32>
      %51 = vector.shape_cast %48 : vector<4x128xf32> to vector<1x4x128xf32>
      tpu.vector_store %arg6[%c1_36, %c0_37, %c0_38], %51 {strides = array<i32>} : memref<9x4x128xf32, #tpu.memory_space<vmem>>, vector<1x4x128xf32>,
      %52 = arith.addf %37, %46 : vector<4x128xf32>
      %c2 = arith.constant 2 : index
      %c0_39 = arith.constant 0 : index
      %c0_40 = arith.constant 0 : index
      %53 = vector.load %arg4[%c2, %c0_39, %c0_40] : memref<9x4x128xf32, #tpu.memory_space<vmem>>, vector<1x4x128xf32>
      %54 = vector.shape_cast %53 : vector<1x4x128xf32> to vector<4x128xf32>
      %55 = vector.broadcast %32 : vector<4x1xf32> to vector<4x128xf32>
      %56 = arith.mulf %54, %55 : vector<4x128xf32>
      %c2_41 = arith.constant 2 : index
      %c0_42 = arith.constant 0 : index
      %c0_43 = arith.constant 0 : index
      %57 = vector.load %arg6[%c2_41, %c0_42, %c0_43] : memref<9x4x128xf32, #tpu.memory_space<vmem>>, vector<1x4x128xf32>
      %58 = vector.shape_cast %57 : vector<1x4x128xf32> to vector<4x128xf32>
      %59 = vector.shape_cast %56 : vector<4x128xf32> to vector<1x4x128xf32>
      tpu.vector_store %arg6[%c2_41, %c0_42, %c0_43], %59 {strides = array<i32>} : memref<9x4x128xf32, #tpu.memory_space<vmem>>, vector<1x4x128xf32>,
      %60 = arith.addf %52, %54 : vector<4x128xf32>
      %c3 = arith.constant 3 : index
      %c0_44 = arith.constant 0 : index
      %c0_45 = arith.constant 0 : index
      %61 = vector.load %arg4[%c3, %c0_44, %c0_45] : memref<9x4x128xf32, #tpu.memory_space<vmem>>, vector<1x4x128xf32>
      %62 = vector.shape_cast %61 : vector<1x4x128xf32> to vector<4x128xf32>
      %63 = vector.broadcast %32 : vector<4x1xf32> to vector<4x128xf32>
      %64 = arith.mulf %62, %63 : vector<4x128xf32>
      %c3_46 = arith.constant 3 : index
      %c0_47 = arith.constant 0 : index
      %c0_48 = arith.constant 0 : index
      %65 = vector.load %arg6[%c3_46, %c0_47, %c0_48] : memref<9x4x128xf32, #tpu.memory_space<vmem>>, vector<1x4x128xf32>
      %66 = vector.shape_cast %65 : vector<1x4x128xf32> to vector<4x128xf32>
      %67 = vector.shape_cast %64 : vector<4x128xf32> to vector<1x4x128xf32>
      tpu.vector_store %arg6[%c3_46, %c0_47, %c0_48], %67 {strides = array<i32>} : memref<9x4x128xf32, #tpu.memory_space<vmem>>, vector<1x4x128xf32>,
      %68 = arith.addf %60, %62 : vector<4x128xf32>
      %c4 = arith.constant 4 : index
      %c0_49 = arith.constant 0 : index
      %c0_50 = arith.constant 0 : index
      %69 = vector.load %arg4[%c4, %c0_49, %c0_50] : memref<9x4x128xf32, #tpu.memory_space<vmem>>, vector<1x4x128xf32>
      %70 = vector.shape_cast %69 : vector<1x4x128xf32> to vector<4x128xf32>
      %71 = vector.broadcast %32 : vector<4x1xf32> to vector<4x128xf32>
      %72 = arith.mulf %70, %71 : vector<4x128xf32>
      %c4_51 = arith.constant 4 : index
      %c0_52 = arith.constant 0 : index
      %c0_53 = arith.constant 0 : index
      %73 = vector.load %arg6[%c4_51, %c0_52, %c0_53] : memref<9x4x128xf32, #tpu.memory_space<vmem>>, vector<1x4x128xf32>
      %74 = vector.shape_cast %73 : vector<1x4x128xf32> to vector<4x128xf32>
      %75 = vector.shape_cast %72 : vector<4x128xf32> to vector<1x4x128xf32>
      tpu.vector_store %arg6[%c4_51, %c0_52, %c0_53], %75 {strides = array<i32>} : memref<9x4x128xf32, #tpu.memory_space<vmem>>, vector<1x4x128xf32>,
      %76 = arith.addf %68, %70 : vector<4x128xf32>
      %c5 = arith.constant 5 : index
      %c0_54 = arith.constant 0 : index
      %c0_55 = arith.constant 0 : index
      %77 = vector.load %arg4[%c5, %c0_54, %c0_55] : memref<9x4x128xf32, #tpu.memory_space<vmem>>, vector<1x4x128xf32>
      %78 = vector.shape_cast %77 : vector<1x4x128xf32> to vector<4x128xf32>
      %79 = vector.broadcast %32 : vector<4x1xf32> to vector<4x128xf32>
      %80 = arith.mulf %78, %79 : vector<4x128xf32>
      %c5_56 = arith.constant 5 : index
      %c0_57 = arith.constant 0 : index
      %c0_58 = arith.constant 0 : index
      %81 = vector.load %arg6[%c5_56, %c0_57, %c0_58] : memref<9x4x128xf32, #tpu.memory_space<vmem>>, vector<1x4x128xf32>
      %82 = vector.shape_cast %81 : vector<1x4x128xf32> to vector<4x128xf32>
      %83 = vector.shape_cast %80 : vector<4x128xf32> to vector<1x4x128xf32>
      tpu.vector_store %arg6[%c5_56, %c0_57, %c0_58], %83 {strides = array<i32>} : memref<9x4x128xf32, #tpu.memory_space<vmem>>, vector<1x4x128xf32>,
      %84 = arith.addf %76, %78 : vector<4x128xf32>
      %c6 = arith.constant 6 : index
      %c0_59 = arith.constant 0 : index
      %c0_60 = arith.constant 0 : index
      %85 = vector.load %arg4[%c6, %c0_59, %c0_60] : memref<9x4x128xf32, #tpu.memory_space<vmem>>, vector<1x4x128xf32>
      %86 = vector.shape_cast %85 : vector<1x4x128xf32> to vector<4x128xf32>
      %87 = vector.broadcast %32 : vector<4x1xf32> to vector<4x128xf32>
      %88 = arith.mulf %86, %87 : vector<4x128xf32>
      %c6_61 = arith.constant 6 : index
      %c0_62 = arith.constant 0 : index
      %c0_63 = arith.constant 0 : index
      %89 = vector.load %arg6[%c6_61, %c0_62, %c0_63] : memref<9x4x128xf32, #tpu.memory_space<vmem>>, vector<1x4x128xf32>
      %90 = vector.shape_cast %89 : vector<1x4x128xf32> to vector<4x128xf32>
      %91 = vector.shape_cast %88 : vector<4x128xf32> to vector<1x4x128xf32>
      tpu.vector_store %arg6[%c6_61, %c0_62, %c0_63], %91 {strides = array<i32>} : memref<9x4x128xf32, #tpu.memory_space<vmem>>, vector<1x4x128xf32>,
      %92 = arith.addf %84, %86 : vector<4x128xf32>
      %c7 = arith.constant 7 : index
      %c0_64 = arith.constant 0 : index
      %c0_65 = arith.constant 0 : index
      %93 = vector.load %arg4[%c7, %c0_64, %c0_65] : memref<9x4x128xf32, #tpu.memory_space<vmem>>, vector<1x4x128xf32>
      %94 = vector.shape_cast %93 : vector<1x4x128xf32> to vector<4x128xf32>
      %95 = vector.broadcast %32 : vector<4x1xf32> to vector<4x128xf32>
      %96 = arith.mulf %94, %95 : vector<4x128xf32>
      %c7_66 = arith.constant 7 : index
      %c0_67 = arith.constant 0 : index
      %c0_68 = arith.constant 0 : index
      %97 = vector.load %arg6[%c7_66, %c0_67, %c0_68] : memref<9x4x128xf32, #tpu.memory_space<vmem>>, vector<1x4x128xf32>
      %98 = vector.shape_cast %97 : vector<1x4x128xf32> to vector<4x128xf32>
      %99 = vector.shape_cast %96 : vector<4x128xf32> to vector<1x4x128xf32>
      tpu.vector_store %arg6[%c7_66, %c0_67, %c0_68], %99 {strides = array<i32>} : memref<9x4x128xf32, #tpu.memory_space<vmem>>, vector<1x4x128xf32>,
      %100 = arith.addf %92, %94 : vector<4x128xf32>
      %c8 = arith.constant 8 : index
      %c0_69 = arith.constant 0 : index
      %c0_70 = arith.constant 0 : index
      %101 = vector.load %arg4[%c8, %c0_69, %c0_70] : memref<9x4x128xf32, #tpu.memory_space<vmem>>, vector<1x4x128xf32>
      %102 = vector.shape_cast %101 : vector<1x4x128xf32> to vector<4x128xf32>
      %103 = vector.broadcast %32 : vector<4x1xf32> to vector<4x128xf32>
      %104 = arith.mulf %102, %103 : vector<4x128xf32>
      %c8_71 = arith.constant 8 : index
      %c0_72 = arith.constant 0 : index
      %c0_73 = arith.constant 0 : index
      %105 = vector.load %arg6[%c8_71, %c0_72, %c0_73] : memref<9x4x128xf32, #tpu.memory_space<vmem>>, vector<1x4x128xf32>
      %106 = vector.shape_cast %105 : vector<1x4x128xf32> to vector<4x128xf32>
      %107 = vector.shape_cast %104 : vector<4x128xf32> to vector<1x4x128xf32>
      tpu.vector_store %arg6[%c8_71, %c0_72, %c0_73], %107 {strides = array<i32>} : memref<9x4x128xf32, #tpu.memory_space<vmem>>, vector<1x4x128xf32>,
      %108 = arith.addf %100, %102 : vector<4x128xf32>
      %c0_74 = arith.constant 0 : index
      %c0_75 = arith.constant 0 : index
      %109 = vector.load %arg5[%c0_74, %c0_75] : memref<1x128xf32, #tpu.memory_space<vmem>>, vector<1x128xf32>
      %110 = vector.broadcast %35 : vector<4x1xf32> to vector<4x128xf32>
      %111 = arith.mulf %110, %108 : vector<4x128xf32>
      %cst_76 = arith.constant dense<0.000000e+00> : vector<128xf32>
      %112 = vector.multi_reduction <add>, %111, %cst_76 [0] : vector<4x128xf32> to vector<128xf32>
      %113 = vector.shape_cast %112 : vector<128xf32> to vector<1x128xf32>
      %114 = arith.addf %109, %113 : vector<1x128xf32>
      %c0_77 = arith.constant 0 : index
      %c0_78 = arith.constant 0 : index
      %115 = vector.load %arg7[%c0_77, %c0_78] : memref<1x128xf32, #tpu.memory_space<vmem>>, vector<1x128xf32>
      tpu.vector_store %arg7[%c0_77, %c0_78], %114 {strides = array<i32>} : memref<1x128xf32, #tpu.memory_space<vmem>>, vector<1x128xf32>,
    } else {
    }
    return
  }
  func.func @transform_0(%arg0: i32) -> (i32, i32) {
    %c0_i32 = arith.constant 0 : i32
    %c0_i32_0 = arith.constant 0 : i32
    return %c0_i32, %arg0 : i32, i32
  }
  func.func @transform_1(%arg0: i32) -> (i32, i32) {
    %c0_i32 = arith.constant 0 : i32
    %c0_i32_0 = arith.constant 0 : i32
    %c0_i32_1 = arith.constant 0 : i32
    return %c0_i32, %c0_i32_0 : i32, i32
  }
  func.func @transform_2(%arg0: i32) -> (i32, i32) {
    %c0_i32 = arith.constant 0 : i32
    %c0_i32_0 = arith.constant 0 : i32
    %c0_i32_1 = arith.constant 0 : i32
    return %c0_i32, %c0_i32_0 : i32, i32
  }
  func.func @transform_3(%arg0: i32) -> (i32, i32, i32) {
    %c0_i32 = arith.constant 0 : i32
    %c0_i32_0 = arith.constant 0 : i32
    %c0_i32_1 = arith.constant 0 : i32
    %c0_i32_2 = arith.constant 0 : i32
    return %c0_i32, %c0_i32_0, %c0_i32_1 : i32, i32, i32
  }
  func.func @transform_4(%arg0: i32) -> (i32, i32) {
    %c0_i32 = arith.constant 0 : i32
    %c0_i32_0 = arith.constant 0 : i32
    %c0_i32_1 = arith.constant 0 : i32
    return %c0_i32, %c0_i32_0 : i32, i32
  }
  func.func @transform_5(%arg0: i32) -> (i32, i32, i32) {
    %c0_i32 = arith.constant 0 : i32
    %c0_i32_0 = arith.constant 0 : i32
    %c0_i32_1 = arith.constant 0 : i32
    %c0_i32_2 = arith.constant 0 : i32
    return %c0_i32, %c0_i32_0, %c0_i32_1 : i32, i32, i32
  }
  func.func @transform_6(%arg0: i32) -> (i32, i32) {
    %c0_i32 = arith.constant 0 : i32
    %c0_i32_0 = arith.constant 0 : i32
    %c0_i32_1 = arith.constant 0 : i32
    return %c0_i32, %c0_i32_0 : i32, i32
  }
}

module attributes {stable_mosaic.version = 11 : i64} {
  func.func @conv_fold_kernel(%arg0: i32, %arg1: memref<256x36xf32, #tpu.memory_space<vmem>>, %arg2: memref<36x128xf32, #tpu.memory_space<vmem>>, %arg3: memref<1x128xf32, #tpu.memory_space<vmem>>, %arg4: memref<256x128xf32, #tpu.memory_space<vmem>>) attributes {dimension_semantics = [#tpu.dimension_semantics<parallel>], iteration_bounds = array<i64: 2>, scalar_prefetch = 0 : i64, scratch_operands = 0 : i64, tpu.core_type = #tpu.core_type<tc>, window_params = [{transform_indices = @transform_0, window_bounds = array<i64: 256, 36>}, {pipeline_mode = #tpu.pipeline_mode<synchronous>, transform_indices = @transform_1, window_bounds = array<i64: 36, 128>}, {pipeline_mode = #tpu.pipeline_mode<synchronous>, transform_indices = @transform_2, window_bounds = array<i64: 1, 128>}, {transform_indices = @transform_3, window_bounds = array<i64: 256, 128>}]} {
    %c0 = arith.constant 0 : index
    %c0_0 = arith.constant 0 : index
    %0 = vector.load %arg1[%c0, %c0_0] : memref<256x36xf32, #tpu.memory_space<vmem>>, vector<256x36xf32>
    %c0_1 = arith.constant 0 : index
    %c0_2 = arith.constant 0 : index
    %1 = vector.load %arg2[%c0_1, %c0_2] : memref<36x128xf32, #tpu.memory_space<vmem>>, vector<36x128xf32>
    %cst = arith.constant dense<0.000000e+00> : vector<256x128xf32>
    %2 = tpu.matmul %0, %1, %cst {dimension_numbers = #tpu.dot_dimension_numbers<[1], [0], [0], [1], [0, 0, 1, 1], [], []>} : vector<256x36xf32>, vector<36x128xf32>, vector<256x128xf32> -> vector<256x128xf32>
    %c0_3 = arith.constant 0 : index
    %c0_4 = arith.constant 0 : index
    %3 = vector.load %arg3[%c0_3, %c0_4] : memref<1x128xf32, #tpu.memory_space<vmem>>, vector<1x128xf32>
    %4 = vector.broadcast %3 : vector<1x128xf32> to vector<256x128xf32>
    %5 = arith.addf %2, %4 : vector<256x128xf32>
    %c0_5 = arith.constant 0 : index
    %c0_6 = arith.constant 0 : index
    %6 = vector.load %arg4[%c0_5, %c0_6] : memref<256x128xf32, #tpu.memory_space<vmem>>, vector<256x128xf32>
    tpu.vector_store %arg4[%c0_5, %c0_6], %5 {strides = array<i32>} : memref<256x128xf32, #tpu.memory_space<vmem>>, vector<256x128xf32>,
    return
  }
  func.func @transform_0(%arg0: i32) -> (i32, i32) {
    %c0_i32 = arith.constant 0 : i32
    %c0_i32_0 = arith.constant 0 : i32
    return %arg0, %c0_i32 : i32, i32
  }
  func.func @transform_1(%arg0: i32) -> (i32, i32) {
    %c0_i32 = arith.constant 0 : i32
    %c0_i32_0 = arith.constant 0 : i32
    %c0_i32_1 = arith.constant 0 : i32
    return %c0_i32, %c0_i32_0 : i32, i32
  }
  func.func @transform_2(%arg0: i32) -> (i32, i32) {
    %c0_i32 = arith.constant 0 : i32
    %c0_i32_0 = arith.constant 0 : i32
    %c0_i32_1 = arith.constant 0 : i32
    return %c0_i32, %c0_i32_0 : i32, i32
  }
  func.func @transform_3(%arg0: i32) -> (i32, i32) {
    %c0_i32 = arith.constant 0 : i32
    %c0_i32_0 = arith.constant 0 : i32
    return %arg0, %c0_i32 : i32, i32
  }
}

</mosaic_0001>

<bundles_post_ra>
// kernel: net_forward.2
= control target key start
LH: loop header
LB: loop body
LE: loop exit
PB: predicated region body
PF: predicated region fallthrough
CT: control target
= control target key end

     0   :  { %vm38_vm0 = vcmask 1043456   ;;  %vm26_vm1 = vcmask 3072   ;;  %v192_v2 = vmov 0.0   ;;  %v193_v23 = vmov 0   ;;  %s314_s0 = inlined_call_operand.vmem [shape: f32[4,512], index: 0, kind: input, shape index: {}]   ;;  %s315_s1 = inlined_call_operand.vmem [shape: f32[4,1], index: 1, kind: input, shape index: {}]   ;;  %s316_s2 = inlined_call_operand.vmem [shape: f32[4,1], index: 2, kind: input, shape index: {}]   ;;  %s317_s3 = inlined_call_operand.vmem [shape: f32[9,4,128], index: 3, kind: input, shape index: {}]   ;;  %s318_s5 = inlined_call_operand.vmem [shape: f32[9,4,128], index: 5, kind: output, shape index: {0}]   ;;  %s319_s4 = inlined_call_operand.vmem [shape: f32[1,128], index: 4, kind: input, shape index: {}]   ;;  %s320_s6 = inlined_call_operand.vmem [shape: f32[1,128], index: 6, kind: output, shape index: {1}]  }
   0x1   :  { %v29_v0 = vld [vmem:[%s314_s0] sm:$0xff]  ;;  %v30_v1 = vld [vmem:[%s314_s0 + $0x8] sm:$0xff]  ;;  %27 = vst.msk [vmem:[#allocation2] sm:$0xf] %vm26_vm1, %v192_v2  ;;  %28 = vst.msk [vmem:[#allocation3] sm:$0xf] %vm26_vm1, %v192_v2  ;;  %186 = vset.pattern.permute.xlu1 %v193_v23  ;;  %187 = vset.pattern.permute.xlu0 %v193_v23 }
   0x2   :  { %v34_v3 = vcombine.high %v29_v0, %v29_v0  ;;  %v35_v4 = vcombine.high %v30_v1, %v30_v1  ;;  %v39_v5 = vsel %vm38_vm0, %v29_v0, 0.0  ;;  %v52_v6 = vmul.f32 %v29_v0, %v29_v0  ;;  %v81_v38 = vld [vmem:[%s315_s1] sm:$0xf]  ;;  %v168_v45 = vld [vmem:[%s317_s3 + $0x4] sm:$0xf] }
   0x3   :  { %v53_v7 = vmul.f32 %v30_v1, %v30_v1  ;;  %v42_v9 = vsel %vm38_vm0, %v30_v1, 0.0  ;;  %v85_v41 = vld [vmem:[%s316_s2] sm:$0xf]  ;;  %v170_v47 = vld [vmem:[%s317_s3 + $0x8] sm:$0xf] }
   0x4   :  { %v40_v8 = vsel %vm38_vm0, %v34_v3, 0.0  ;;  %v56_v11 = vcombine.high %v52_v6, %v52_v6  ;;  %v60_v13 = vsel %vm38_vm0, %v52_v6, 0.0  ;;  %v44_v14 = vsel %vm38_vm0, %v35_v4, 0.0  ;;  %v88_v44 = vld [vmem:[%s317_s3] sm:$0xf] }
   0x5   :  { %v41_v10 = vadd.f32 %v40_v8, %v39_v5  ;;  %v57_v12 = vcombine.high %v53_v7, %v53_v7  ;;  %v63_v17 = vsel %vm38_vm0, %v53_v7, 0.0  ;;  %v101_v46 = vadd.f32 %v168_v45, %v88_v44  ;;  %v172_v49 = vld [vmem:[%s317_s3 + $0xc] sm:$0xf]  ;;  %v174_v51 = vld [vmem:[%s317_s3 + $0x10] sm:$0xf] }
   0x6   :  { %v61_v16 = vsel %vm38_vm0, %v56_v11, 0.0  ;;  %v176_v53 = vld [vmem:[%s317_s3 + $0x14] sm:$0xf]  ;;  %v178_v55 = vld [vmem:[%s317_s3 + $0x18] sm:$0xf] }
   0x7   :  { %v43_v15 = vadd.f32 %v42_v9, %v41_v10  ;;  %v62_v18 = vadd.f32 %v61_v16, %v60_v13  ;;  %v65_v20 = vsel %vm38_vm0, %v57_v12, 0.0  ;;  %v107_v48 = vadd.f32 %v170_v47, %v101_v46  ;;  %v180_v57 = vld [vmem:[%s317_s3 + $0x1c] sm:$0xf]  ;;  %v182_v59 = vld [vmem:[%s317_s3 + $0x20] sm:$0xf] }
   0x8   :  { %v31_v24 = vld [vmem:[#allocation2] sm:$0xf]  ;;  %v51_v27 = vld [vmem:[#allocation3] sm:$0xf] }
   0x9   :  { %v45_v19 = vadd.f32 %v44_v14, %v43_v15  ;;  %v64_v21 = vadd.f32 %v63_v17, %v62_v18  ;;  %v113_v50 = vadd.f32 %v172_v49, %v107_v48  ;;  %v144_v15 = vld [vmem:[%s319_s4] sm:$0x1] }
   0xb   :  { %46 = vadd.xlane.f32.xlu0 %v45_v19  ;;  %v66_v22 = vadd.f32 %v65_v20, %v64_v21  ;;  %v119_v52 = vadd.f32 %v174_v51, %v113_v50 }
   0xd   :  { %v125_v54 = vadd.f32 %v176_v53, %v119_v52 }
   0xf   :  { %67 = vadd.xlane.f32.xlu0 %v66_v22  ;;  %v131_v56 = vadd.f32 %v178_v55, %v125_v54 }
  0x11   :  { %v137_v58 = vadd.f32 %v180_v57, %v131_v56 }
  0x13   :  { %v143_v60 = vadd.f32 %v182_v59, %v137_v58 }
  0x98   :  { %v47_v25 = vpop.xlane.xlu0 %46 }
  0x99   :  { %v48_v26 = vadd.f32 %v47_v25, %v31_v24 }
  0x9b   :  { %50 = vst.msk [vmem:[#allocation2] sm:$0xf] %vm26_vm1, %v48_v26 }
  0x9c   :  { %v68_v28 = vpop.xlane.xlu0 %67 }
  0x9d   :  { %v69_v29 = vadd.f32 %v68_v28, %v51_v27 }
  0x9f   :  { %70 = vst.msk [vmem:[#allocation3] sm:$0xf] %vm26_vm1, %v69_v29 }
  0xa2   :  { %v74_v30 = vld [vmem:[#allocation2] sm:$0xf] }
  0xa3   :  { %v75_v31 = vmul.f32 0.001953125, %v74_v30 }
  0xa5   :  { %v78_v34 = vmul.f32 %v75_v31, %v75_v31 }
  0xa6   :  { %v76_v32 = vld [vmem:[#allocation3] sm:$0xf] }
  0xa7   :  { %v77_v33 = vmul.f32 0.001953125, %v76_v32 }
  0xa9   :  { %v79_v35 = vsub.f32 %v77_v33, %v78_v34 }
  0xab   :  { %v80_v36 = vmax.f32 %v79_v35, 0.0 }
  0xad   :  { %v82_v37 = vadd.f32 1e-05, %v80_v36 }
  0xaf   :  { %190 = vrsqrt.f32 %v82_v37 }
  0xb9   :  { %v191_v39 = vpop.eup %190 }
  0xba   :  { %v84_v40 = vmul.f32 %v191_v39, %v81_v38 }
  0xbc   :  { %v86_v42 = vmul.f32 %v84_v40, %v75_v31 }
  0xbe   :  { %v87_v43 = vsub.f32 %v85_v41, %v86_v42 }
  0xc0   :  { %147 = vperm.xlu1 %186, %v87_v43  }
  0xc4   :  { %91 = vperm.xlu1 %186, %v84_v40  }
 0x13f   :  { %v148_v61 = vpop.permute.xlu1 %147 }
 0x140   :  { %v150_v62 = vmul.f32 %v148_v61, %v143_v60 }
 0x142   :  { %v151_v63 = vsel %vm38_vm0, %v150_v62, 0.0 }
 0x143   :  { %v152_v0 = vrot.slane %v151_v63, 4  ;;  %v92_v1 = vpop.permute.xlu1 %91 }
 0x144   :  { %v94_v2 = vmul.f32 %v92_v1, %v88_v44  ;;  %v98_v3 = vmul.f32 %v168_v45, %v92_v1  ;;  %v104_v4 = vmul.f32 %v170_v47, %v92_v1  ;;  %v110_v5 = vmul.f32 %v172_v49, %v92_v1 }
 0x145   :  { %v153_v6 = vadd.f32 %v152_v0, %v151_v63  ;;  %v116_v7 = vmul.f32 %v174_v51, %v92_v1  ;;  %v122_v8 = vmul.f32 %v176_v53, %v92_v1  ;;  %v128_v9 = vmul.f32 %v178_v55, %v92_v1 }
 0x146   :  { %95 = vst [vmem:[%s318_s5] sm:$0xf] %v94_v2  ;;  %169 = vst [vmem:[%s318_s5 + $0x4] sm:$0xf] %v98_v3  ;;  %v134_v10 = vmul.f32 %v180_v57, %v92_v1  ;;  %v140_v11 = vmul.f32 %v182_v59, %v92_v1 }
 0x147   :  { %171 = vst [vmem:[%s318_s5 + $0x8] sm:$0xf] %v104_v4  ;;  %173 = vst [vmem:[%s318_s5 + $0xc] sm:$0xf] %v110_v5  ;;  %v154_v12 = vrot.slane %v153_v6, 2 }
 0x148   :  { %175 = vst [vmem:[%s318_s5 + $0x10] sm:$0xf] %v116_v7  ;;  %177 = vst [vmem:[%s318_s5 + $0x14] sm:$0xf] %v122_v8 }
 0x149   :  { %179 = vst [vmem:[%s318_s5 + $0x18] sm:$0xf] %v128_v9  ;;  %181 = vst [vmem:[%s318_s5 + $0x1c] sm:$0xf] %v134_v10  ;;  %v155_v13 = vadd.f32 %v154_v12, %v153_v6 }
 0x14a   :  { %183 = vst [vmem:[%s318_s5 + $0x20] sm:$0xf] %v140_v11 }
 0x14b   :  { %v156_v14 = vrot.slane %v155_v13, 1 }
 0x14d   :  { %v157_v16 = vadd.f32 %v156_v14, %v155_v13 }
 0x14f   :  { %v158_v17 = vadd.f32 %v157_v16, %v144_v15 }
 0x151   :  { %159 = vst [vmem:[%s320_s6] sm:$0x1] %v158_v17 }

// kernel: net_forward.3
= control target key start
LH: loop header
LB: loop body
LE: loop exit
PB: predicated region body
PF: predicated region fallthrough
CT: control target
= control target key end

     0   :  { %s822_s12 = smov 0   ;;  %s1002_s0 = inlined_call_operand.vmem [shape: f32[512,36], index: 0, kind: input, shape index: {}]   ;;  %s1003_s1 = inlined_call_operand.vmem [shape: f32[36,128], index: 1, kind: input, shape index: {}]   ;;  %s1004_s2 = inlined_call_operand.vmem [shape: f32[1,128], index: 2, kind: input, shape index: {}]   ;;  %s1005_s3 = inlined_call_operand.vmem [shape: f32[512,128], index: 3, kind: output, shape index: {}]  }
   0x1 LB: > { %s632_s13 = sadd.s32 4294967295, %s800_s12   ;;  %p636_p0 = scmp.ge.s32.totalorder %s800_s12, 1  ;;  %s800_s12 = sphi %s822_s12, %s13_s12  }
   0x2   : > { %p138_p1 = scmp.lt.s32.totalorder %s800_s12, 3 }
   0x4   : > { %p139_p2 = pnand %p636_p0, %p138_p1 }
   0x5   : > { %v206_v0 = vld [vmem:[%s1003_s1] sm:$0xff] (!%p139_p2)  ;;  %v207_v1 = vld [vmem:[%s1003_s1 + $0x8] sm:$0xff] (!%p139_p2)  ;;  %v208_v2 = vld [vmem:[%s1003_s1 + $0x10] sm:$0xff] (!%p139_p2)  ;;  %s637_s20 = sshll.u32 (!%p139_p2), %s632_s13, 5  ;;  %vm315_vm0 = vcmask (!%p139_p2), 1043456   ;;  %vm218_vm1 = vcmask (!%p139_p2), 293888  }
   0x6   : > { %142 = sbr.rel (%p139_p2) target bundleno = 263 (0x107), region = 32  ;;  %v772_v3 = vpack.c.bf16 (!%p139_p2), %v207_v1, %v206_v0  ;;  %v209_v4 = vld [vmem:[%s1003_s1 + $0x18] sm:$0xff] (!%p139_p2)  ;;  %p163_p3 = scmp.lt.s32.totalorder (!%p139_p2), %s637_s20, 63  ;;  %v210_v6 = vld [vmem:[%s1003_s1 + $0x20] sm:$0xf] (!%p139_p2) }
   0x7   : > { %v776_v5 = vpack.c.bf16 (!%p139_p2), %v209_v4, %v208_v2  ;;  %v926_v39 = vld [vmem:[%s1004_s2] ss:$0 sm:$0xff] (!%p139_p2) }
   0x8   : > { %773 = vmatprep.subr.bf16.mxu0 (!%p139_p2), %v772_v3  ;;  %780 = vmatprep.subr.bf16.mxu1 (!%p139_p2), %v772_v3 }
   0x9   : > { %775 = vmatpush3.bf16.msra.mxu0 (!%p139_p2), %v772_v3  ;;  %783 = vmatpush3.bf16.msra.mxu1 (!%p139_p2), %v772_v3 }
   0xa   : > { %777 = vmatprep.subr.bf16.mxu0 (!%p139_p2), %v776_v5  ;;  %781 = vmatprep.subr.bf16.mxu1 (!%p139_p2), %v776_v5 }
   0xd   : > { %s1007_s20 = smov (!%p163_p3, %s637_s20), 63  ;;  %779 = vmatpush3.bf16.msra.mxu0 %v776_v5  ;;  %784 = vmatpush3.bf16.msra.mxu1 %v776_v5 }
   0xe   : > { %s638_s23 = sshll.u32 %s1007_s20, 3  ;;  %722 = vmatprep.subr.msk.mxu0 %vm315_vm0, %v210_v6  ;;  %782 = vmatprep.subr.msk.mxu1 %vm315_vm0, %v210_v6 }
   0xf   : > { %s853_s28 = scalar_lea.vmem %s1002_s0, %s638_s23  ;;  %s933_s6 = scalar_lea.vmem %s1005_s3, %s638_s23 }
  0x10   : > { %v174_v7 = vld [vmem:[%s853_s28] sm:$0xff]  ;;  %v175_v9 = vld [vmem:[%s853_s28 + $0x8] sm:$0xff]  ;;  %v176_v11 = vld [vmem:[%s853_s28 + $0x10] sm:$0xff] }
  0x11   : > { %v190_v8 = vld [vmem:[%s853_s28 + $0x80] sm:$0xff]  ;;  %724 = vmatprep.mubr.msk.f32.mxu0 %vm218_vm1, %v174_v7  ;;  %v191_v10 = vld [vmem:[%s853_s28 + $0x88] sm:$0xff]  ;;  %v192_v12 = vld [vmem:[%s853_s28 + $0x90] sm:$0xff]  ;;  %723 = vmatpush3.msk.msra.mxu0 %vm315_vm0, %v210_v6 }
  0x12   : > { %748 = vmatprep.mubr.msk.f32.mxu1 %vm218_vm1, %v190_v8  ;;  %785 = vmatpush3.msk.msra.mxu1 %vm315_vm0, %v210_v6  ;;  %v177_v13 = vld [vmem:[%s853_s28 + $0x18] sm:$0xff]  ;;  %v178_v15 = vld [vmem:[%s853_s28 + $0x20] sm:$0xff]  ;;  %v179_v17 = vld [vmem:[%s853_s28 + $0x28] sm:$0xff] }
  0x13   : > { %725 = vmatmul.mubr.msk.f32.vlgmr.msra.gmra.mrb[0].mxu0 %vm218_vm1, %v175_v9  ;;  %749 = vmatmul.mubr.msk.f32.vlgmr.msra.gmra.mrb[0].mxu1 %vm218_vm1, %v191_v10  ;;  %v193_v14 = vld [vmem:[%s853_s28 + $0x98] sm:$0xff]  ;;  %v194_v16 = vld [vmem:[%s853_s28 + $0xa0] sm:$0xff]  ;;  %v195_v18 = vld [vmem:[%s853_s28 + $0xa8] sm:$0xff] }
  0x14   : > { %727 = vmatprep.mubr.msk.f32.mxu0 %vm218_vm1, %v176_v11  ;;  %751 = vmatprep.mubr.msk.f32.mxu1 %vm218_vm1, %v192_v12  ;;  %v180_v19 = vld [vmem:[%s853_s28 + $0x30] sm:$0xff]  ;;  %v181_v21 = vld [vmem:[%s853_s28 + $0x38] sm:$0xff]  ;;  %v182_v23 = vld [vmem:[%s853_s28 + $0x40] sm:$0xff] }
  0x15   : > { %v196_v20 = vld [vmem:[%s853_s28 + $0xb0] sm:$0xff]  ;;  %v197_v22 = vld [vmem:[%s853_s28 + $0xb8] sm:$0xff]  ;;  %v198_v24 = vld [vmem:[%s853_s28 + $0xc0] sm:$0xff] }
  0x16   : > { %v183_v25 = vld [vmem:[%s853_s28 + $0x48] sm:$0xff]  ;;  %v184_v27 = vld [vmem:[%s853_s28 + $0x50] sm:$0xff]  ;;  %v185_v29 = vld [vmem:[%s853_s28 + $0x58] sm:$0xff] }
  0x17   : > { %728 = vmatmul.mubr.msk.f32.gmra.mrb[2].mxu0 %vm218_vm1, %v177_v13  ;;  %752 = vmatmul.mubr.msk.f32.gmra.mrb[2].mxu1 %vm218_vm1, %v193_v14  ;;  %v199_v26 = vld [vmem:[%s853_s28 + $0xc8] sm:$0xff]  ;;  %v200_v28 = vld [vmem:[%s853_s28 + $0xd0] sm:$0xff]  ;;  %v201_v30 = vld [vmem:[%s853_s28 + $0xd8] sm:$0xff] }
  0x18   : > { %730 = vmatprep.mubr.msk.f32.mxu0 %vm218_vm1, %v178_v15  ;;  %754 = vmatprep.mubr.msk.f32.mxu1 %vm218_vm1, %v194_v16  ;;  %v186_v31 = vld [vmem:[%s853_s28 + $0x60] sm:$0xff]  ;;  %v187_v33 = vld [vmem:[%s853_s28 + $0x68] sm:$0xff]  ;;  %v188_v35 = vld [vmem:[%s853_s28 + $0x70] sm:$0xff] }
  0x19   : > { %v202_v32 = vld [vmem:[%s853_s28 + $0xe0] sm:$0xff]  ;;  %v203_v34 = vld [vmem:[%s853_s28 + $0xe8] sm:$0xff]  ;;  %v204_v36 = vld [vmem:[%s853_s28 + $0xf0] sm:$0xff] }
  0x1a   : > { %v189_v37 = vld [vmem:[%s853_s28 + $0x78] sm:$0xff] }
  0x1b   : > { %731 = vmatmul.mubr.msk.f32.gmra.mrb[4].mxu0 %vm218_vm1, %v179_v17  ;;  %755 = vmatmul.mubr.msk.f32.gmra.mrb[4].mxu1 %vm218_vm1, %v195_v18  ;;  %v205_v38 = vld [vmem:[%s853_s28 + $0xf8] sm:$0xff] }
  0x1c   : > { %733 = vmatprep.mubr.msk.f32.mxu0 %vm218_vm1, %v180_v19  ;;  %757 = vmatprep.mubr.msk.f32.mxu1 %vm218_vm1, %v196_v20 }
  0x1f   : > { %734 = vmatmul.mubr.msk.f32.gmra.mrb[6].mxu0 %vm218_vm1, %v181_v21  ;;  %758 = vmatmul.mubr.msk.f32.gmra.mrb[6].mxu1 %vm218_vm1, %v197_v22 }
  0x20   : > { %736 = vmatprep.mubr.msk.f32.mxu0 %vm218_vm1, %v182_v23  ;;  %760 = vmatprep.mubr.msk.f32.mxu1 %vm218_vm1, %v198_v24 }
  0x23   : > { %737 = vmatmul.mubr.msk.f32.gmra.mrb[8].mxu0 %vm218_vm1, %v183_v25  ;;  %761 = vmatmul.mubr.msk.f32.gmra.mrb[8].mxu1 %vm218_vm1, %v199_v26 }
  0x24   : > { %739 = vmatprep.mubr.msk.f32.mxu0 %vm218_vm1, %v184_v27  ;;  %763 = vmatprep.mubr.msk.f32.mxu1 %vm218_vm1, %v200_v28 }
  0x27   : > { %740 = vmatmul.mubr.msk.f32.gmra.mrb[10].mxu0 %vm218_vm1, %v185_v29  ;;  %764 = vmatmul.mubr.msk.f32.gmra.mrb[10].mxu1 %vm218_vm1, %v201_v30 }
  0x28   : > { %742 = vmatprep.mubr.msk.f32.mxu0 %vm218_vm1, %v186_v31  ;;  %766 = vmatprep.mubr.msk.f32.mxu1 %vm218_vm1, %v202_v32 }
  0x2b   : > { %743 = vmatmul.mubr.msk.f32.gmra.mrb[12].mxu0 %vm218_vm1, %v187_v33  ;;  %767 = vmatmul.mubr.msk.f32.gmra.mrb[12].mxu1 %vm218_vm1, %v203_v34 }
  0x2c   : > { %745 = vmatprep.mubr.msk.f32.mxu0 %vm218_vm1, %v188_v35  ;;  %769 = vmatprep.mubr.msk.f32.mxu1 %vm218_vm1, %v204_v36 }
  0x2f   : > { %746 = vmatmul.mubr.msk.f32.gmra.mrb[14].mxu0 %vm218_vm1, %v189_v37  ;;  %770 = vmatmul.mubr.msk.f32.gmra.mrb[14].mxu1 %vm218_vm1, %v205_v38 }
  0xe6   : > { %v726_v40 = vpop.f32.mrb[0].mxu0  ;;  %v750_v41 = vpop.f32.mrb[0].mxu1 }
  0xe7   : > { %v391_v42 = vadd.f32 %v726_v40, %v926_v39  ;;  %v471_v43 = vadd.f32 %v750_v41, %v926_v39  ;;  %v385_v44 = vpop.f32.mrb[1].mxu0  ;;  %v465_v45 = vpop.f32.mrb[1].mxu1 }
  0xe8   : > { %v386_v46 = vadd.f32 %v926_v39, %v385_v44  ;;  %v466_v47 = vadd.f32 %v926_v39, %v465_v45 }
  0xe9   : > { %545 = vst [vmem:[%s933_s6 + $0x8] sm:$0xff] %v391_v42  ;;  %561 = vst [vmem:[%s933_s6 + $0x88] sm:$0xff] %v471_v43 }
  0xea   : > { %544 = vst [vmem:[%s933_s6] sm:$0xff] %v386_v46  ;;  %560 = vst [vmem:[%s933_s6 + $0x80] sm:$0xff] %v466_v47  ;;  %v729_v48 = vpop.f32.mrb[2].mxu0  ;;  %v753_v49 = vpop.f32.mrb[2].mxu1 }
  0xeb   : > { %v401_v50 = vadd.f32 %v729_v48, %v926_v39  ;;  %v481_v51 = vadd.f32 %v753_v49, %v926_v39  ;;  %v395_v52 = vpop.f32.mrb[3].mxu0  ;;  %v475_v53 = vpop.f32.mrb[3].mxu1 }
  0xec   : > { %v396_v54 = vadd.f32 %v926_v39, %v395_v52  ;;  %v476_v55 = vadd.f32 %v926_v39, %v475_v53 }
  0xed   : > { %547 = vst [vmem:[%s933_s6 + $0x18] sm:$0xff] %v401_v50  ;;  %563 = vst [vmem:[%s933_s6 + $0x98] sm:$0xff] %v481_v51 }
  0xee   : > { %546 = vst [vmem:[%s933_s6 + $0x10] sm:$0xff] %v396_v54  ;;  %562 = vst [vmem:[%s933_s6 + $0x90] sm:$0xff] %v476_v55  ;;  %v732_v56 = vpop.f32.mrb[4].mxu0  ;;  %v756_v57 = vpop.f32.mrb[4].mxu1 }
  0xef   : > { %v411_v58 = vadd.f32 %v732_v56, %v926_v39  ;;  %v491_v59 = vadd.f32 %v756_v57, %v926_v39  ;;  %v405_v60 = vpop.f32.mrb[5].mxu0  ;;  %v485_v61 = vpop.f32.mrb[5].mxu1 }
  0xf0   : > { %v406_v62 = vadd.f32 %v926_v39, %v405_v60  ;;  %v486_v63 = vadd.f32 %v926_v39, %v485_v61 }
  0xf1   : > { %549 = vst [vmem:[%s933_s6 + $0x28] sm:$0xff] %v411_v58  ;;  %565 = vst [vmem:[%s933_s6 + $0xa8] sm:$0xff] %v491_v59 }
  0xf2   : > { %548 = vst [vmem:[%s933_s6 + $0x20] sm:$0xff] %v406_v62  ;;  %564 = vst [vmem:[%s933_s6 + $0xa0] sm:$0xff] %v486_v63  ;;  %v735_v0 = vpop.f32.mrb[6].mxu0  ;;  %v759_v1 = vpop.f32.mrb[6].mxu1 }
  0xf3   : > { %v421_v2 = vadd.f32 %v735_v0, %v926_v39  ;;  %v501_v3 = vadd.f32 %v759_v1, %v926_v39  ;;  %v415_v4 = vpop.f32.mrb[7].mxu0  ;;  %v495_v5 = vpop.f32.mrb[7].mxu1 }
  0xf4   : > { %v416_v6 = vadd.f32 %v926_v39, %v415_v4  ;;  %v496_v7 = vadd.f32 %v926_v39, %v495_v5 }
  0xf5   : > { %551 = vst [vmem:[%s933_s6 + $0x38] sm:$0xff] %v421_v2  ;;  %567 = vst [vmem:[%s933_s6 + $0xb8] sm:$0xff] %v501_v3 }
  0xf6   : > { %550 = vst [vmem:[%s933_s6 + $0x30] sm:$0xff] %v416_v6  ;;  %566 = vst [vmem:[%s933_s6 + $0xb0] sm:$0xff] %v496_v7  ;;  %v738_v8 = vpop.f32.mrb[8].mxu0  ;;  %v762_v9 = vpop.f32.mrb[8].mxu1 }
  0xf7   : > { %v431_v10 = vadd.f32 %v738_v8, %v926_v39  ;;  %v511_v11 = vadd.f32 %v762_v9, %v926_v39  ;;  %v425_v12 = vpop.f32.mrb[9].mxu0  ;;  %v505_v13 = vpop.f32.mrb[9].mxu1 }
  0xf8   : > { %v426_v14 = vadd.f32 %v926_v39, %v425_v12  ;;  %v506_v15 = vadd.f32 %v926_v39, %v505_v13 }
  0xf9   : > { %553 = vst [vmem:[%s933_s6 + $0x48] sm:$0xff] %v431_v10  ;;  %569 = vst [vmem:[%s933_s6 + $0xc8] sm:$0xff] %v511_v11 }
  0xfa   : > { %552 = vst [vmem:[%s933_s6 + $0x40] sm:$0xff] %v426_v14  ;;  %568 = vst [vmem:[%s933_s6 + $0xc0] sm:$0xff] %v506_v15  ;;  %v741_v16 = vpop.f32.mrb[10].mxu0  ;;  %v765_v17 = vpop.f32.mrb[10].mxu1 }
  0xfb   : > { %v441_v18 = vadd.f32 %v741_v16, %v926_v39  ;;  %v521_v19 = vadd.f32 %v765_v17, %v926_v39  ;;  %v435_v20 = vpop.f32.mrb[11].mxu0  ;;  %v515_v21 = vpop.f32.mrb[11].mxu1 }
  0xfc   : > { %v436_v22 = vadd.f32 %v926_v39, %v435_v20  ;;  %v516_v23 = vadd.f32 %v926_v39, %v515_v21 }
  0xfd   : > { %555 = vst [vmem:[%s933_s6 + $0x58] sm:$0xff] %v441_v18  ;;  %571 = vst [vmem:[%s933_s6 + $0xd8] sm:$0xff] %v521_v19 }
  0xfe   : > { %554 = vst [vmem:[%s933_s6 + $0x50] sm:$0xff] %v436_v22  ;;  %570 = vst [vmem:[%s933_s6 + $0xd0] sm:$0xff] %v516_v23  ;;  %v744_v24 = vpop.f32.mrb[12].mxu0  ;;  %v768_v25 = vpop.f32.mrb[12].mxu1 }
  0xff   : > { %v451_v26 = vadd.f32 %v744_v24, %v926_v39  ;;  %v531_v27 = vadd.f32 %v768_v25, %v926_v39  ;;  %v445_v28 = vpop.f32.mrb[13].mxu0  ;;  %v525_v29 = vpop.f32.mrb[13].mxu1 }
 0x100   : > { %v446_v30 = vadd.f32 %v926_v39, %v445_v28  ;;  %v526_v31 = vadd.f32 %v926_v39, %v525_v29 }
 0x101   : > { %557 = vst [vmem:[%s933_s6 + $0x68] sm:$0xff] %v451_v26  ;;  %573 = vst [vmem:[%s933_s6 + $0xe8] sm:$0xff] %v531_v27 }
 0x102   : > { %556 = vst [vmem:[%s933_s6 + $0x60] sm:$0xff] %v446_v30  ;;  %572 = vst [vmem:[%s933_s6 + $0xe0] sm:$0xff] %v526_v31  ;;  %v747_v32 = vpop.f32.mrb[14].mxu0  ;;  %v771_v33 = vpop.f32.mrb[14].mxu1 }
 0x103   : > { %v461_v34 = vadd.f32 %v747_v32, %v926_v39  ;;  %v541_v35 = vadd.f32 %v771_v33, %v926_v39  ;;  %v455_v36 = vpop.f32.mrb[15].mxu0  ;;  %v535_v37 = vpop.f32.mrb[15].mxu1 }
 0x104   : > { %v456_v38 = vadd.f32 %v926_v39, %v455_v36  ;;  %v536_v40 = vadd.f32 %v926_v39, %v535_v37 }
 0x105   : > { %559 = vst [vmem:[%s933_s6 + $0x78] sm:$0xff] %v461_v34  ;;  %575 = vst [vmem:[%s933_s6 + $0xf8] sm:$0xff] %v541_v35 }
 0x106   : > { %558 = vst [vmem:[%s933_s6 + $0x70] sm:$0xff] %v456_v38  ;;  %574 = vst [vmem:[%s933_s6 + $0xf0] sm:$0xff] %v536_v40 }
 0x107 PF: > { %s13_s12 = sadd.s32 1, %s800_s12  }
 0x108   : > { %p10_p4 = scmp.ge.s32.totalorder %s13_s12, 4  }
 0x10a   :  { %12 = sbr.rel (!%p10_p4) target bundleno = 1 (0x1), region = 62 }

</bundles_post_ra>
